<compile_context>
chip_gen: v5e
topology: v5e:2x2
jax: 0.10.0
libtpu: 0.0.40
codegen_flags: <defaults>
</compile_context>

<pallas_src>
import jax
import jax.numpy as jnp
from jax import lax
from jax.experimental import pallas as pl
from jax.experimental.pallas import tpu as pltpu

BN_EPS = 1e-5


def _largest_divisor_leq(n, cap):
    for t in range(min(n, cap), 0, -1):
        if n % t == 0:
            return t
    return 1


# ---------------------------------------------------------------------------
# Kernel 1: pooling branch folded into a per-batch effective projection bias.
#   bias_eff[n] = proj_b + ReLU(mean_hw(x[n]) @ (pool_w * pool_s) + pool_b)
#                           @ (P_pool * proj_s)
# The padded input is summed block-by-block (padding rows/cols are zeros, so
# they do not change the sum); division by H*W gives the exact mean.
# ---------------------------------------------------------------------------
def _make_pool_bias_kernel(th, Wp, Cin, inv_hw):
    def kernel(x_ref, pw_ref, pb_ref, p4_ref, projb_ref, o_ref, acc_ref):
        r = pl.program_id(1)

        @pl.when(r == 0)
        def _():
            acc_ref[...] = jnp.zeros_like(acc_ref)

        acc_ref[...] += jnp.sum(x_ref[0].reshape(th * Wp, Cin),
                                axis=0, keepdims=True)

        @pl.when(r == pl.num_programs(1) - 1)
        def _():
            mean = acc_ref[...] * inv_hw                                # (1, Cin)
            y = jnp.dot(mean, pw_ref[...], preferred_element_type=jnp.float32)
            y = jnp.maximum(y + pb_ref[...], 0.0)                       # (1, Cout)
            be = projb_ref[...] + jnp.dot(y, p4_ref[...],
                                          preferred_element_type=jnp.float32)
            o_ref[0] = be                                               # (1, Cout)

    return kernel


# ---------------------------------------------------------------------------
# Kernel 2: fully fused ASPP body for one (batch, row-tile) grid step.
#   - assembles a halo'd row window from m overlapping row blocks,
#   - computes the 1x1 branch and every dilated 3x3 branch (+bias, ReLU),
#   - accumulates each branch directly into the projection (Y_b @ P_b),
#   - adds the per-batch effective bias (pool branch folded in) and ReLUs.
# Only the final (th, W, Cout) tile is written to HBM.
# ---------------------------------------------------------------------------
def _make_fused_kernel(rates, dmax, th, W, Cin, Cout, m):
    nr = len(rates)

    def kernel(*refs):
        it = iter(refs)
        x_refs = [next(it) for _ in range(m)]    # m * (1, th, Wp, Cin)
        bias_ref = next(it)                      # (1, 1, Cout) effective proj bias
        b0w_ref = next(it)                       # (Cin, Cout)   BN scale folded
        b0b_ref = next(it)                       # (1, Cout)
        rw, rb = [], []
        for _ in range(nr):
            rw.append(next(it))                  # (3, 3, Cin, Cout) BN scale folded
            rb.append(next(it))                  # (1, Cout)
        p_ref = next(it)                         # (nr + 1, Cout, Cout) proj scale folded
        o_ref = next(it)                         # (1, th, W, Cout)
        win_ref = next(it)                       # VMEM scratch (m * th, Wp, Cin)

        # Assemble the halo'd row window from the m pipelined row blocks.
        for j in range(m):
            win_ref[j * th:(j + 1) * th] = x_refs[j][0]

        def patch(row0, col0):
            # Static-offset window slice -> (th * W, Cin) matmul operand.
            return win_ref[row0:row0 + th, col0:col0 + W, :].reshape(th * W, Cin)

        # Branch 0: 1x1 conv + BN + ReLU, projected on the fly.
        y = jnp.dot(patch(dmax, dmax), b0w_ref[...],
                    preferred_element_type=jnp.float32)
        y = jnp.maximum(y + b0b_ref[...], 0.0)
        acc = jnp.dot(y, p_ref[0], preferred_element_type=jnp.float32)

        # Dilated 3x3 branches (padding == dilation), projected on the fly.
        for i, d in enumerate(rates):
            conv = None
            for ky in range(3):
                for kx in range(3):
                    t = jnp.dot(patch(dmax - d + ky * d, dmax - d + kx * d),
                                rw[i][ky, kx],
                                preferred_element_type=jnp.float32)
                    conv = t if conv is None else conv + t
            y = jnp.maximum(conv + rb[i][...], 0.0)
            acc = acc + jnp.dot(y, p_ref[i + 1],
                                preferred_element_type=jnp.float32)

        out = jnp.maximum(acc + bias_ref[0], 0.0)
        o_ref[0] = out.reshape(th, W, Cout)

    return kernel


# ---------------------------------------------------------------------------
# ASPP forward (Pallas)
# ---------------------------------------------------------------------------
def aspp_forward(x_nchw, params, atrous_rates, *, max_row_tile=8,
                 vmem_limit_bytes=32 * 1024 * 1024):
    rates = tuple(int(r) for r in atrous_rates)
    nr = len(rates)
    x = jnp.transpose(x_nchw, (0, 2, 3, 1)).astype(jnp.float32)   # NCHW -> NHWC
    N, H, W, Cin = x.shape
    Cout = params["b0_w"].shape[1]
    dmax = max(rates)

    # Row tiling with halo: each output tile of `th` rows needs th + 2*dmax
    # padded rows, delivered as `m` overlapping th-row blocks.
    th = _largest_divisor_leq(H, max_row_tile)
    R = H // th
    m = 1 + (2 * dmax + th - 1) // th
    pad_bot = (m - 1) * th - dmax                 # >= dmax by construction
    xp = jnp.pad(x, ((0, 0), (dmax, pad_bot), (dmax, dmax), (0, 0)))
    Wp = W + 2 * dmax
    R_ext = (H + (m - 1) * th) // th              # = R + m - 1

    # Fold BN scales into weights (per-output-channel), keep biases separate.
    b0_w = params["b0_w"] * params["b0_scale"][None, :]
    b0_b = params["b0_bias"].reshape(1, Cout)
    rate_w = [params[f"br{i}_w"] * params[f"br{i}_scale"][None, None, None, :]
              for i in range(nr)]
    rate_b = [params[f"br{i}_bias"].reshape(1, Cout) for i in range(nr)]
    pool_w = params["pool_w"] * params["pool_scale"][None, :]
    pool_b = params["pool_bias"].reshape(1, Cout)
    proj_w = params["proj_w"] * params["proj_scale"][None, :]     # ((2+nr)*Cout, Cout)
    p_blocks = proj_w.reshape(nr + 2, Cout, Cout)                 # [b0, rates..., pool]
    p_main = p_blocks[:nr + 1]
    p_pool = p_blocks[nr + 1]
    proj_b = params["proj_bias"].reshape(1, Cout)

    # --- Kernel 1: per-batch effective projection bias (pool branch folded) --
    bias_eff = pl.pallas_call(
        _make_pool_bias_kernel(th, Wp, Cin, 1.0 / float(H * W)),
        out_shape=jax.ShapeDtypeStruct((N, 1, Cout), jnp.float32),
        grid_spec=pltpu.PrefetchScalarGridSpec(
            num_scalar_prefetch=0,
            grid=(N, R_ext),
            in_specs=[
                pl.BlockSpec((1, th, Wp, Cin), lambda n, r: (n, r, 0, 0)),
                pl.BlockSpec((Cin, Cout), lambda n, r: (0, 0)),
                pl.BlockSpec((1, Cout), lambda n, r: (0, 0)),
                pl.BlockSpec((Cout, Cout), lambda n, r: (0, 0)),
                pl.BlockSpec((1, Cout), lambda n, r: (0, 0)),
            ],
            out_specs=pl.BlockSpec((1, 1, Cout), lambda n, r: (n, 0, 0)),
            scratch_shapes=[pltpu.VMEM((1, Cin), jnp.float32)],
        ),
        compiler_params=pltpu.CompilerParams(
            dimension_semantics=("parallel", "arbitrary"),
            vmem_limit_bytes=vmem_limit_bytes),
    )(xp, pool_w, pool_b, p_pool, proj_b)

    # --- Kernel 2: fused branches + projection -------------------------------
    in_specs = [pl.BlockSpec((1, th, Wp, Cin),
                             (lambda n, r, j=j: (n, r + j, 0, 0)))
                for j in range(m)]
    args = [xp] * m
    in_specs += [
        pl.BlockSpec((1, 1, Cout), lambda n, r: (n, 0, 0)),       # bias_eff
        pl.BlockSpec((Cin, Cout), lambda n, r: (0, 0)),           # b0_w
        pl.BlockSpec((1, Cout), lambda n, r: (0, 0)),             # b0_b
    ]
    args += [bias_eff, b0_w, b0_b]
    for i in range(nr):
        in_specs += [
            pl.BlockSpec((3, 3, Cin, Cout), lambda n, r: (0, 0, 0, 0)),
            pl.BlockSpec((1, Cout), lambda n, r: (0, 0)),
        ]
        args += [rate_w[i], rate_b[i]]
    in_specs.append(pl.BlockSpec((nr + 1, Cout, Cout), lambda n, r: (0, 0, 0)))
    args.append(p_main)

    out = pl.pallas_call(
        _make_fused_kernel(rates, dmax, th, W, Cin, Cout, m),
        out_shape=jax.ShapeDtypeStruct((N, H, W, Cout), jnp.float32),
        grid_spec=pltpu.PrefetchScalarGridSpec(
            num_scalar_prefetch=0,
            grid=(N, R),
            in_specs=in_specs,
            out_specs=pl.BlockSpec((1, th, W, Cout), lambda n, r: (n, r, 0, 0)),
            scratch_shapes=[pltpu.VMEM((m * th, Wp, Cin), jnp.float32)],
        ),
        compiler_params=pltpu.CompilerParams(
            dimension_semantics=("parallel", "parallel"),
            vmem_limit_bytes=vmem_limit_bytes),
    )(*args)

    # Dropout(0.5): identity (inference mode).
    return jnp.transpose(out, (0, 3, 1, 2))                       # NHWC -> NCHW


# ---------------------------------------------------------------------------
# Pure-JAX reference (same parameterization) and parameter init
# ---------------------------------------------------------------------------
def aspp_reference(x_nchw, params, atrous_rates):
    x = jnp.transpose(x_nchw, (0, 2, 3, 1)).astype(jnp.float32)
    dn = ("NHWC", "HWIO", "NHWC")
    hp = lax.Precision.HIGHEST
    outs = []
    y = lax.conv_general_dilated(x, params["b0_w"][None, None], (1, 1), "VALID",
                                 dimension_numbers=dn, precision=hp)
    outs.append(jnp.maximum(y * params["b0_scale"] + params["b0_bias"], 0.0))
    for i, d in enumerate(atrous_rates):
        y = lax.conv_general_dilated(x, params[f"br{i}_w"], (1, 1),
                                     [(d, d), (d, d)], rhs_dilation=(d, d),
                                     dimension_numbers=dn, precision=hp)
        outs.append(jnp.maximum(y * params[f"br{i}_scale"] + params[f"br{i}_bias"], 0.0))
    m = jnp.mean(x, axis=(1, 2), keepdims=True)
    y = lax.conv_general_dilated(m, params["pool_w"][None, None], (1, 1), "VALID",
                                 dimension_numbers=dn, precision=hp)
    y = jnp.maximum(y * params["pool_scale"] + params["pool_bias"], 0.0)
    outs.append(jnp.broadcast_to(y, x.shape[:3] + (y.shape[-1],)))
    cat = jnp.concatenate(outs, axis=-1)
    y = lax.conv_general_dilated(cat, params["proj_w"][None, None], (1, 1), "VALID",
                                 dimension_numbers=dn, precision=hp)
    y = jnp.maximum(y * params["proj_scale"] + params["proj_bias"], 0.0)
    return jnp.transpose(y, (0, 3, 1, 2))


def init_params(key, Cin, atrous_rates, Cout):
    ks = iter(jax.random.split(key, 4 * (3 + len(atrous_rates))))

    def bn_fold(k):
        k1, k2, k3, k4 = jax.random.split(k, 4)
        gamma = jax.random.uniform(k1, (Cout,), minval=0.5, maxval=1.5)
        beta = 0.1 * jax.random.normal(k2, (Cout,))
        mean = 0.1 * jax.random.normal(k3, (Cout,))
        var = jax.random.uniform(k4, (Cout,), minval=0.5, maxval=1.5)
        scale = gamma / jnp.sqrt(var + BN_EPS)
        bias = beta - mean * scale
        return scale.astype(jnp.float32), bias.astype(jnp.float32)

    nbranch = 2 + len(atrous_rates)
    p = {}
    p["b0_w"] = (0.1 * jax.random.normal(next(ks), (Cin, Cout))).astype(jnp.float32)
    p["b0_scale"], p["b0_bias"] = bn_fold(next(ks))
    for i, _ in enumerate(atrous_rates):
        p[f"br{i}_w"] = (0.1 * jax.random.normal(next(ks), (3, 3, Cin, Cout))).astype(jnp.float32)
        p[f"br{i}_scale"], p[f"br{i}_bias"] = bn_fold(next(ks))
    p["pool_w"] = (0.1 * jax.random.normal(next(ks), (Cin, Cout))).astype(jnp.float32)
    p["pool_scale"], p["pool_bias"] = bn_fold(next(ks))
    p["proj_w"] = (0.1 * jax.random.normal(next(ks), (nbranch * Cout, Cout))).astype(jnp.float32)
    p["proj_scale"], p["proj_bias"] = bn_fold(next(ks))
    return p


if __name__ == "__main__":
    key = jax.random.PRNGKey(0)
    kx, kp = jax.random.split(key)
    N, Cin, H, W = 2, 8, 16, 16
    Cout = 32
    rates = (1, 2, 3)

    x = jax.random.normal(kx, (N, Cin, H, W), dtype=jnp.float32)
    params = init_params(kp, Cin, rates, Cout)

    out = aspp_forward(x, params, rates)
    out = jax.block_until_ready(out)

    ref = aspp_reference(x, params, rates)
    assert out.shape == (N, Cout, H, W)
    assert jnp.allclose(out, ref, rtol=5e-2, atol=5e-2)
    print("KERNEL_OK")
</pallas_src>

<mosaic_0001>
module attributes {stable_mosaic.version = 11 : i64} {
  func.func @kernel(%arg0: i32, %arg1: i32, %arg2: memref<1x8x22x8xf32, #tpu.memory_space<vmem>>, %arg3: memref<8x32xf32, #tpu.memory_space<vmem>>, %arg4: memref<1x32xf32, #tpu.memory_space<vmem>>, %arg5: memref<32x32xf32, #tpu.memory_space<vmem>>, %arg6: memref<1x32xf32, #tpu.memory_space<vmem>>, %arg7: memref<1x1x32xf32, #tpu.memory_space<vmem>>, %arg8: memref<1x8xf32, #tpu.memory_space<vmem>>) attributes {dimension_semantics = [#tpu.dimension_semantics<parallel>, #tpu.dimension_semantics<arbitrary>], iteration_bounds = array<i64: 2, 3>, scalar_prefetch = 0 : i64, scratch_operands = 1 : i64, tpu.core_type = #tpu.core_type<tc>, window_params = [{transform_indices = @transform_0, window_bounds = array<i64: 1, 8, 22, 8>}, {pipeline_mode = #tpu.pipeline_mode<synchronous>, transform_indices = @transform_1, window_bounds = array<i64: 8, 32>}, {pipeline_mode = #tpu.pipeline_mode<synchronous>, transform_indices = @transform_2, window_bounds = array<i64: 1, 32>}, {pipeline_mode = #tpu.pipeline_mode<synchronous>, transform_indices = @transform_3, window_bounds = array<i64: 32, 32>}, {pipeline_mode = #tpu.pipeline_mode<synchronous>, transform_indices = @transform_4, window_bounds = array<i64: 1, 32>}, {transform_indices = @transform_5, window_bounds = array<i64: 1, 1, 32>}]} {
    %c0_i32 = arith.constant 0 : i32
    %0 = arith.cmpi eq, %arg1, %c0_i32 : i32
    %1 = arith.extui %0 : i1 to i32
    %c0_i32_0 = arith.constant 0 : i32
    %2 = arith.cmpi ne, %1, %c0_i32_0 : i32
    scf.if %2 {
      %cst_9 = arith.constant 0.000000e+00 : f32
      %14 = vector.broadcast %cst_9 : f32 to vector<1x8xf32>
      %c0_10 = arith.constant 0 : index
      %c0_11 = arith.constant 0 : index
      %15 = vector.load %arg8[%c0_10, %c0_11] : memref<1x8xf32, #tpu.memory_space<vmem>>, vector<1x8xf32>
      tpu.vector_store %arg8[%c0_10, %c0_11], %14 {strides = array<i32>} : memref<1x8xf32, #tpu.memory_space<vmem>>, vector<1x8xf32>,
    } else {
    }
    %c0 = arith.constant 0 : index
    %c0_1 = arith.constant 0 : index
    %3 = vector.load %arg8[%c0, %c0_1] : memref<1x8xf32, #tpu.memory_space<vmem>>, vector<1x8xf32>
    %c0_2 = arith.constant 0 : index
    %c0_3 = arith.constant 0 : index
    %c0_4 = arith.constant 0 : index
    %c0_5 = arith.constant 0 : index
    %4 = vector.load %arg2[%c0_2, %c0_3, %c0_4, %c0_5] : memref<1x8x22x8xf32, #tpu.memory_space<vmem>>, vector<1x8x22x8xf32>
    %5 = vector.shape_cast %4 : vector<1x8x22x8xf32> to vector<8x22x8xf32>
    %6 = vector.shape_cast %5 : vector<8x22x8xf32> to vector<176x8xf32>
    %cst = arith.constant dense<0.000000e+00> : vector<8xf32>
    %7 = vector.multi_reduction <add>, %6, %cst [0] : vector<176x8xf32> to vector<8xf32>
    %8 = vector.shape_cast %7 : vector<8xf32> to vector<1x8xf32>
    %9 = arith.addf %3, %8 : vector<1x8xf32>
    %c0_6 = arith.constant 0 : index
    %c0_7 = arith.constant 0 : index
    %10 = vector.load %arg8[%c0_6, %c0_7] : memref<1x8xf32, #tpu.memory_space<vmem>>, vector<1x8xf32>
    tpu.vector_store %arg8[%c0_6, %c0_7], %9 {strides = array<i32>} : memref<1x8xf32, #tpu.memory_space<vmem>>, vector<1x8xf32>,
    %c2_i32 = arith.constant 2 : i32
    %11 = arith.cmpi eq, %arg1, %c2_i32 : i32
    %12 = arith.extui %11 : i1 to i32
    %c0_i32_8 = arith.constant 0 : i32
    %13 = arith.cmpi ne, %12, %c0_i32_8 : i32
    scf.if %13 {
      %c0_9 = arith.constant 0 : index
      %c0_10 = arith.constant 0 : index
      %14 = vector.load %arg8[%c0_9, %c0_10] : memref<1x8xf32, #tpu.memory_space<vmem>>, vector<1x8xf32>
      %cst_11 = arith.constant 3.906250e-03 : f32
      %15 = vector.broadcast %cst_11 : f32 to vector<1x8xf32>
      %16 = arith.mulf %14, %15 : vector<1x8xf32>
      %c0_12 = arith.constant 0 : index
      %c0_13 = arith.constant 0 : index
      %17 = vector.load %arg3[%c0_12, %c0_13] : memref<8x32xf32, #tpu.memory_space<vmem>>, vector<8x32xf32>
      %cst_14 = arith.constant dense<0.000000e+00> : vector<1x32xf32>
      %18 = tpu.matmul %16, %17, %cst_14 {dimension_numbers = #tpu.dot_dimension_numbers<[1], [0], [0], [1], [0, 0, 1, 1], [], []>} : vector<1x8xf32>, vector<8x32xf32>, vector<1x32xf32> -> vector<1x32xf32>
      %c0_15 = arith.constant 0 : index
      %c0_16 = arith.constant 0 : index
      %19 = vector.load %arg4[%c0_15, %c0_16] : memref<1x32xf32, #tpu.memory_space<vmem>>, vector<1x32xf32>
      %20 = arith.addf %18, %19 : vector<1x32xf32>
      %cst_17 = arith.constant 0.000000e+00 : f32
      %21 = vector.broadcast %cst_17 : f32 to vector<1x32xf32>
      %22 = arith.maximumf %20, %21 : vector<1x32xf32>
      %c0_18 = arith.constant 0 : index
      %c0_19 = arith.constant 0 : index
      %23 = vector.load %arg6[%c0_18, %c0_19] : memref<1x32xf32, #tpu.memory_space<vmem>>, vector<1x32xf32>
      %c0_20 = arith.constant 0 : index
      %c0_21 = arith.constant 0 : index
      %24 = vector.load %arg5[%c0_20, %c0_21] : memref<32x32xf32, #tpu.memory_space<vmem>>, vector<32x32xf32>
      %cst_22 = arith.constant dense<0.000000e+00> : vector<1x32xf32>
      %25 = tpu.matmul %22, %24, %cst_22 {dimension_numbers = #tpu.dot_dimension_numbers<[1], [0], [0], [1], [0, 0, 1, 1], [], []>} : vector<1x32xf32>, vector<32x32xf32>, vector<1x32xf32> -> vector<1x32xf32>
      %26 = arith.addf %23, %25 : vector<1x32xf32>
      %c0_23 = arith.constant 0 : index
      %c0_24 = arith.constant 0 : index
      %c0_25 = arith.constant 0 : index
      %27 = vector.load %arg7[%c0_23, %c0_24, %c0_25] : memref<1x1x32xf32, #tpu.memory_space<vmem>>, vector<1x1x32xf32>
      %28 = vector.shape_cast %27 : vector<1x1x32xf32> to vector<1x32xf32>
      %29 = vector.shape_cast %26 : vector<1x32xf32> to vector<1x1x32xf32>
      tpu.vector_store %arg7[%c0_23, %c0_24, %c0_25], %29 {strides = array<i32>} : memref<1x1x32xf32, #tpu.memory_space<vmem>>, vector<1x1x32xf32>,
    } else {
    }
    return
  }
  func.func @transform_0(%arg0: i32, %arg1: i32) -> (i32, i32, i32, i32) {
    %c0_i32 = arith.constant 0 : i32
    %c0_i32_0 = arith.constant 0 : i32
    %c0_i32_1 = arith.constant 0 : i32
    return %arg0, %arg1, %c0_i32, %c0_i32_0 : i32, i32, i32, i32
  }
  func.func @transform_1(%arg0: i32, %arg1: i32) -> (i32, i32) {
    %c0_i32 = arith.constant 0 : i32
    %c0_i32_0 = arith.constant 0 : i32
    %c0_i32_1 = arith.constant 0 : i32
    return %c0_i32, %c0_i32_0 : i32, i32
  }
  func.func @transform_2(%arg0: i32, %arg1: i32) -> (i32, i32) {
    %c0_i32 = arith.constant 0 : i32
    %c0_i32_0 = arith.constant 0 : i32
    %c0_i32_1 = arith.constant 0 : i32
    return %c0_i32, %c0_i32_0 : i32, i32
  }
  func.func @transform_3(%arg0: i32, %arg1: i32) -> (i32, i32) {
    %c0_i32 = arith.constant 0 : i32
    %c0_i32_0 = arith.constant 0 : i32
    %c0_i32_1 = arith.constant 0 : i32
    return %c0_i32, %c0_i32_0 : i32, i32
  }
  func.func @transform_4(%arg0: i32, %arg1: i32) -> (i32, i32) {
    %c0_i32 = arith.constant 0 : i32
    %c0_i32_0 = arith.constant 0 : i32
    %c0_i32_1 = arith.constant 0 : i32
    return %c0_i32, %c0_i32_0 : i32, i32
  }
  func.func @transform_5(%arg0: i32, %arg1: i32) -> (i32, i32, i32) {
    %c0_i32 = arith.constant 0 : i32
    %c0_i32_0 = arith.constant 0 : i32
    %c0_i32_1 = arith.constant 0 : i32
    return %arg0, %c0_i32, %c0_i32_0 : i32, i32, i32
  }
}

</mosaic_0001>

<bundles_post_ra>
// kernel: tpu_custom_call.1
= control target key start
LH: loop header
LB: loop body
LE: loop exit
PB: predicated region body
PF: predicated region fallthrough
CT: control target
= control target key end

     0   :  { %10 = vsyncpa [#allocation4], 0  ;;  %s1158_s0 = inlined_call_operand.vmem [shape: f32[2,24,22,8], index: 0, kind: input, shape index: {}]   ;;  %s1159_s1 = inlined_call_operand.vmem [shape: f32[8,32], index: 1, kind: input, shape index: {}]   ;;  %s1160_s2 = inlined_call_operand.vmem [shape: f32[1,32], index: 2, kind: input, shape index: {}]   ;;  %s1161_s3 = inlined_call_operand.vmem [shape: f32[32,32], index: 3, kind: input, shape index: {}]   ;;  %s1162_s4 = inlined_call_operand.vmem [shape: f32[1,32], index: 4, kind: input, shape index: {}]   ;;  %s1163_s5 = inlined_call_operand.hbm [shape: f32[2,1,32], index: 5, kind: output, shape index: {}]  }
   0x1   :  { %12 = vsyncpa [#allocation4 + $0x1], 0  ;;  %s930_s18 = smov 0   ;;  %s932_s19 = smov 0  }
   0x2   :  { %s934_s20 = smov 0   ;;  %s936_s21 = smov 0  }
   0x3   :  { %s938_s22 = smov 0   ;;  %s940_s23 = smov 0  }
   0x4   :  { %s942_s24 = smov 0   ;;  %s944_s25 = smov 0  }
   0x5 LB: > { %s716_s26 = sadd.s32 4294967295, %s897_s25   ;;  %s717_s27 = sadd.s32 4294967294, %s897_s25   ;;  %s897_s25 = sphi %s944_s25, %s18_s25   ;;  %s893_s24 = sphi %s942_s24, %s1172_s24   ;;  %s889_s23 = sphi %s940_s23, %s1171_s23   ;;  %s885_s22 = sphi %s938_s22, %s1170_s22   ;;  %s881_s21 = sphi %s936_s21, %s1169_s21   ;;  %s877_s20 = sphi %s934_s20, %s1168_s20   ;;  %s873_s19 = sphi %s932_s19, %s1167_s19   ;;  %s869_s18 = sphi %s930_s18, %s1166_s18  }
   0x6   : > { %s27_s28 = sadd.s32 1, %s889_s23  ;;  %s30_s29 = sadd.s32 1, %s893_s24 }
   0x7   : > { %p28_p0 = scmp.ge.s32.totalorder %s27_s28, 3  ;;  %p159_p1 = scmp.ne.s32.totalorder %s877_s20, %s873_s19 }
   0x8   : > { %p160_p2 = scmp.eq.s32.totalorder %s716_s26, 5  ;;  %p165_p4 = scmp.ne.s32.totalorder %s873_s19, %s869_s18 }
   0x9   : > { %s1174_s28 = smov (%p28_p0, %s27_s28), 0  ;;  %s1176_s29 = smov (!%p28_p0, %s30_s29), %s893_s24 }
   0xa   : > { %p979_p3 = por %p160_p2, %p159_p1  ;;  %p32_p5 = scmp.ge.s32.totalorder %s1176_s29, 2 }
   0xb   : > { %p166_p6 = scmp.eq.s32.totalorder %s717_s27, 5  ;;  %p720_p7 = scmp.ge.s32.totalorder %s897_s25, 1 }
   0xc   : > { %p210_p8 = scmp.lt.s32.totalorder %s897_s25, 7  ;;  %s1178_s29 = smov (%p32_p5, %s1176_s29), 0 }
   0xd   : > { %p989_p9 = por %p166_p6, %p165_p4  ;;  %s146_s7 = ssub.s32 %s893_s24, %s1178_s29 }
   0xe   : > { %p211_p10 = pnand %p720_p7, %p210_p8  ;;  %s149_s8 = sadd.s32 1, %s877_s20 }
   0xf   : > { %p147_p11 = scmp.eq.s32.totalorder %s146_s7, 0  ;;  %s240_s10 = sand.u32 (!%p211_p10), 1, %s873_s19  }
  0x10   : > { %214 = sbr.rel (%p211_p10) target bundleno = 459 (0x1cb), region = 40  ;;  %s721_s11 = sshll.u32 (!%p211_p10), %s881_s21, 3 }
  0x11   : > { %s997_s9 = scalar_select %p147_p11, %s877_s20, %s149_s8  }
  0x12   : > { %p243_p12 = scmp.lt.s32.totalorder (!%p211_p10), %s885_s22, 1  ;;  %p245_p13 = scmp.lt.s32.totalorder (!%p211_p10), %s721_s11, 23 }
  0x13   : > { %s1010_s7 = scalar_lea.vmem (!%p211_p10), [#allocation3], %s240_s10  ;;  %p723_p0 = scmp.ne.s32.totalorder (!%p211_p10), %s881_s21, 0 }
  0x15   : > { %s244_s12 = scalar_select %p243_p12, %s885_s22, 1 }
  0x16   : > { %s1180_s11 = smov (!%p245_p13, %s721_s11), 23 }
  0x17   : > { %s730_s13 = smul.u32 72, %s244_s12 }
  0x18   : > { %s729_s14 = smul.u32 3, %s1180_s11 }
  0x19   : > { %256 = sbr.rel (%p723_p0) target bundleno = 32 (0x20), region = 44 }
  0x1a   : > { %s249_s15 = sadd.s32 %s730_s13, %s729_s14 }
  0x1b   : > { %s722_s16 = sshll.u32 %s249_s15, 3 }
  0x1c   : > { %s1006_s27 = scalar_lea.vmem %s1158_s0, %s722_s16 }
  0x1e   : > { %vm257_vm0 = vcmask 57344   ;;  %v899_v0 = vmov 0.0  }
  0x1f   : > { %258 = vst.msk [vmem:[#allocation2] sm:$0x1] %vm257_vm0, %v899_v0 }
  0x20 PF: > { %v260_v1 = vld [vmem:[%s1006_s27] sm:$0xff]  ;;  %v261_v2 = vld [vmem:[%s1006_s27 + $0x8] sm:$0xff]  ;;  %v262_v9 = vld [vmem:[%s1006_s27 + $0x10] sm:$0x3f]  ;;  %vm511_vm1 = vcmask 64512   ;;  %vm562_vm2 = vcmask 57344  }
  0x21   : > { %372 = vst [vmem:[#allocation1] ss:$4 sm:$0xff] %v260_v1  ;;  %v308_v3 = vrot.slane %v260_v1, 2  ;;  %v309_v4 = vrot.slane %v260_v1, 4  ;;  %v310_v5 = vrot.slane %v260_v1, 6  ;;  %v311_v6 = vrot.slane %v261_v2, 2 }
  0x22   : > { %380 = vst [vmem:[#allocation1 + $0x20] ss:$4 sm:$0xff] %v261_v2  ;;  %v312_v7 = vrot.slane %v261_v2, 4  ;;  %v313_v8 = vrot.slane %v261_v2, 6  ;;  %v314_v10 = vrot.slane %v262_v9, 2  ;;  %v263_v11 = vld [vmem:[%s1006_s27 + $0x18] sm:$0xff] }
  0x23   : > { %374 = vst [vmem:[#allocation1 + $0x1] ss:$4 sm:$0xff] %v308_v3  ;;  %v315_v12 = vrot.slane %v262_v9, 4  ;;  %v316_v14 = vrot.slane %v263_v11, 2  ;;  %v317_v15 = vrot.slane %v263_v11, 4  ;;  %v318_v16 = vrot.slane %v263_v11, 6 }
  0x24   : > { %376 = vst [vmem:[#allocation1 + $0x2] ss:$4 sm:$0xff] %v309_v4  ;;  %v264_v18 = vld [vmem:[%s1006_s27 + $0x20] sm:$0xff]  ;;  %v265_v21 = vld [vmem:[%s1006_s27 + $0x28] sm:$0x3f]  ;;  %v266_v25 = vld [vmem:[%s1006_s27 + $0x30] sm:$0xff] }
  0x25   : > { %378 = vst [vmem:[#allocation1 + $0x3] ss:$4 sm:$0xff] %v310_v5  ;;  %v319_v19 = vrot.slane %v264_v18, 2  ;;  %v320_v20 = vrot.slane %v264_v18, 4  ;;  %v321_v22 = vrot.slane %v264_v18, 6  ;;  %v322_v24 = vrot.slane %v265_v21, 2 }
  0x26   : > { %382 = vst [vmem:[#allocation1 + $0x21] ss:$4 sm:$0xff] %v311_v6  ;;  %v323_v26 = vrot.slane %v265_v21, 4  ;;  %v324_v28 = vrot.slane %v266_v25, 2  ;;  %v325_v29 = vrot.slane %v266_v25, 4  ;;  %v267_v30 = vld [vmem:[%s1006_s27 + $0x38] sm:$0xff] }
  0x27   : > { %384 = vst [vmem:[#allocation1 + $0x22] ss:$4 sm:$0xff] %v312_v7  ;;  %v326_v31 = vrot.slane %v266_v25, 6  ;;  %v327_v33 = vrot.slane %v267_v30, 2  ;;  %v328_v34 = vrot.slane %v267_v30, 4  ;;  %v329_v36 = vrot.slane %v267_v30, 6 }
  0x28   : > { %386 = vst [vmem:[#allocation1 + $0x23] ss:$4 sm:$0xff] %v313_v8  ;;  %v268_v35 = vld [vmem:[%s1006_s27 + $0x40] sm:$0x3f]  ;;  %v269_v39 = vld [vmem:[%s1006_s27 + $0x48] sm:$0xff]  ;;  %v270_v44 = vld [vmem:[%s1006_s27 + $0x50] sm:$0xff] }
  0x29   : > { %v330_v38 = vrot.slane %v268_v35, 2  ;;  %v331_v40 = vrot.slane %v268_v35, 4  ;;  %v332_v41 = vrot.slane %v269_v39, 2  ;;  %v333_v43 = vrot.slane %v269_v39, 4  ;;  %v271_v49 = vld [vmem:[%s1006_s27 + $0x58] sm:$0x3f] }
  0x2a   : > { %v334_v45 = vrot.slane %v269_v39, 6  ;;  %v335_v46 = vrot.slane %v270_v44, 2  ;;  %v336_v48 = vrot.slane %v270_v44, 4  ;;  %v337_v50 = vrot.slane %v270_v44, 6  ;;  %v272_v52 = vld [vmem:[%s1006_s27 + $0x60] sm:$0xff]  ;;  %v273_v59 = vld [vmem:[%s1006_s27 + $0x68] sm:$0xff] }
  0x2b   : > { %v338_v51 = vrot.slane %v271_v49, 2  ;;  %v339_v54 = vrot.slane %v271_v49, 4  ;;  %v340_v55 = vrot.slane %v272_v52, 2  ;;  %v341_v56 = vrot.slane %v272_v52, 4  ;;  %v274_v0 = vld [vmem:[%s1006_s27 + $0x70] sm:$0x3f] }
  0x2c   : > { %v1017_v13 = vld.sshfl [vmem:[#allocation1] sm:$0xff pattern:$0x73625140]  ;;  %v342_v58 = vrot.slane %v272_v52, 6  ;;  %v343_v60 = vrot.slane %v273_v59, 2  ;;  %v344_v63 = vrot.slane %v273_v59, 4 }
  0x2d   : > { %389 = vst [vmem:[#allocation1] ss:$4 sm:$0xff] %v262_v9  ;;  %v512_v61 = vsel %vm511_vm1, %v1017_v13, 0.0  ;;  %v345_v2 = vrot.slane %v273_v59, 6  ;;  %v346_v5 = vrot.slane %v274_v0, 2  ;;  %v347_v6 = vrot.slane %v274_v0, 4 }
  0x2e   : > { %390 = vst [vmem:[#allocation1 + $0x1] ss:$4 sm:$0xff] %v314_v10  ;;  %v275_v10 = vld [vmem:[%s1006_s27 + $0x78] sm:$0xff]  ;;  %p724_p1 = scmp.ne.s32.totalorder %s881_s21, 2 }
  0x2f   : > { %391 = vst [vmem:[#allocation1 + $0x2] ss:$4 sm:$0xff] %v315_v12  ;;  %v1019_v17 = vld.sshfl [vmem:[#allocation1 + $0x20] sm:$0xff pattern:$0x73625140]  ;;  %v348_v13 = vrot.slane %v275_v10, 2 }
  0x30   : > { %392 = vst [vmem:[#allocation1 + $0x3] ss:$4 sm:$0xff] %v263_v11  ;;  %v513_v62 = vsel %vm511_vm1, %v1019_v17, 0.0  ;;  %v350_v17 = vrot.slane %v275_v10, 6 }
  0x31   : > { %393 = vst [vmem:[#allocation1 + $0x20] ss:$4 sm:$0xff] %v316_v14  ;;  %v514_v4 = vadd.f32 %v513_v62, %v512_v61  ;;  %v349_v14 = vrot.slane %v275_v10, 4 }
  0x32   : > { %394 = vst [vmem:[#allocation1 + $0x21] ss:$4 sm:$0xff] %v317_v15  ;;  %v276_v15 = vld [vmem:[%s1006_s27 + $0x80] sm:$0xff] }
  0x33   : > { %395 = vst [vmem:[#allocation1 + $0x22] ss:$4 sm:$0xff] %v318_v16 }
  0x34   : > { %396 = vst [vmem:[#allocation1 + $0x23] ss:$4 sm:$0xff] %v264_v18 }
  0x37   : > { %v1023_v23 = vld.sshfl [vmem:[#allocation1] sm:$0xff pattern:$0x73625140] }
  0x38   : > { %399 = vst [vmem:[#allocation1] ss:$4 sm:$0xff] %v319_v19  ;;  %v515_v3 = vsel %vm511_vm1, %v1023_v23, 0.0 }
  0x39   : > { %400 = vst [vmem:[#allocation1 + $0x1] ss:$4 sm:$0xff] %v320_v20  ;;  %v516_v7 = vadd.f32 %v515_v3, %v514_v4  ;;  %v351_v20 = vrot.slane %v276_v15, 2 }
  0x3a   : > { %401 = vst [vmem:[#allocation1 + $0x2] ss:$4 sm:$0xff] %v321_v22  ;;  %v352_v22 = vrot.slane %v276_v15, 4 }
  0x3b   : > { %v1026_v27 = vld.sshfl [vmem:[#allocation1 + $0x20] sm:$0xff pattern:$0x73625140]  ;;  %402 = vst [vmem:[#allocation1 + $0x3] ss:$4 sm:$0xff] %v265_v21 }
  0x3c   : > { %403 = vst [vmem:[#allocation1 + $0x20] ss:$4 sm:$0xff] %v322_v24  ;;  %v517_v9 = vsel %vm511_vm1, %v1026_v27, 0.0  ;;  %v353_v24 = vrot.slane %v276_v15, 6  ;;  %v277_v27 = vld [vmem:[%s1006_s27 + $0x88] sm:$0x3f] }
  0x3d   : > { %404 = vst [vmem:[#allocation1 + $0x21] ss:$4 sm:$0xff] %v323_v26  ;;  %v518_v12 = vadd.f32 %v517_v9, %v516_v7 }
  0x3e   : > { %405 = vst [vmem:[#allocation1 + $0x22] ss:$4 sm:$0xff] %v266_v25 }
  0x3f   : > { %406 = vst [vmem:[#allocation1 + $0x23] ss:$4 sm:$0xff] %v324_v28 }
  0x42   : > { %v1029_v32 = vld.sshfl [vmem:[#allocation1] sm:$0xff pattern:$0x73625140] }
  0x43   : > { %409 = vst [vmem:[#allocation1] ss:$4 sm:$0xff] %v325_v29  ;;  %v519_v11 = vsel %vm511_vm1, %v1029_v32, 0.0 }
  0x44   : > { %410 = vst [vmem:[#allocation1 + $0x1] ss:$4 sm:$0xff] %v326_v31  ;;  %v520_v16 = vadd.f32 %v519_v11, %v518_v12  ;;  %v278_v31 = vld [vmem:[%s1006_s27 + $0x90] sm:$0xff] }
  0x45   : > { %411 = vst [vmem:[#allocation1 + $0x2] ss:$4 sm:$0xff] %v267_v30  ;;  %v354_v30 = vrot.slane %v277_v27, 2 }
  0x46   : > { %v1032_v37 = vld.sshfl [vmem:[#allocation1 + $0x20] sm:$0xff pattern:$0x73625140]  ;;  %412 = vst [vmem:[#allocation1 + $0x3] ss:$4 sm:$0xff] %v327_v33  ;;  %v355_v33 = vrot.slane %v277_v27, 4 }
  0x47   : > { %413 = vst [vmem:[#allocation1 + $0x20] ss:$4 sm:$0xff] %v328_v34  ;;  %v521_v18 = vsel %vm511_vm1, %v1032_v37, 0.0 }
  0x48   : > { %414 = vst [vmem:[#allocation1 + $0x21] ss:$4 sm:$0xff] %v329_v36  ;;  %v522_v23 = vadd.f32 %v521_v18, %v520_v16  ;;  %v356_v36 = vrot.slane %v278_v31, 2 }
  0x49   : > { %415 = vst [vmem:[#allocation1 + $0x22] ss:$4 sm:$0xff] %v268_v35 }
  0x4a   : > { %416 = vst [vmem:[#allocation1 + $0x23] ss:$4 sm:$0xff] %v330_v38  ;;  %v357_v38 = vrot.slane %v278_v31, 4 }
  0x4d   : > { %v1035_v42 = vld.sshfl [vmem:[#allocation1] sm:$0xff pattern:$0x73625140] }
  0x4e   : > { %419 = vst [vmem:[#allocation1] ss:$4 sm:$0xff] %v331_v40  ;;  %v523_v21 = vsel %vm511_vm1, %v1035_v42, 0.0  ;;  %v358_v40 = vrot.slane %v278_v31, 6 }
  0x4f   : > { %420 = vst [vmem:[#allocation1 + $0x1] ss:$4 sm:$0xff] %v269_v39  ;;  %v524_v26 = vadd.f32 %v523_v21, %v522_v23  ;;  %v279_v39 = vld [vmem:[%s1006_s27 + $0x98] sm:$0xff] }
  0x50   : > { %421 = vst [vmem:[#allocation1 + $0x2] ss:$4 sm:$0xff] %v332_v41 }
  0x51   : > { %v1038_v47 = vld.sshfl [vmem:[#allocation1 + $0x20] sm:$0xff pattern:$0x73625140]  ;;  %422 = vst [vmem:[#allocation1 + $0x3] ss:$4 sm:$0xff] %v333_v43 }
  0x52   : > { %423 = vst [vmem:[#allocation1 + $0x20] ss:$4 sm:$0xff] %v334_v45  ;;  %v525_v28 = vsel %vm511_vm1, %v1038_v47, 0.0  ;;  %v360_v47 = vrot.slane %v279_v39, 4 }
  0x53   : > { %424 = vst [vmem:[#allocation1 + $0x21] ss:$4 sm:$0xff] %v270_v44  ;;  %v526_v32 = vadd.f32 %v525_v28, %v524_v26  ;;  %v359_v44 = vrot.slane %v279_v39, 2 }
  0x54   : > { %425 = vst [vmem:[#allocation1 + $0x22] ss:$4 sm:$0xff] %v335_v46 }
  0x55   : > { %426 = vst [vmem:[#allocation1 + $0x23] ss:$4 sm:$0xff] %v336_v48  ;;  %v280_v48 = vld [vmem:[%s1006_s27 + $0xa0] sm:$0x3f] }
  0x58   : > { %v1042_v53 = vld.sshfl [vmem:[#allocation1] sm:$0xff pattern:$0x73625140] }
  0x59   : > { %429 = vst [vmem:[#allocation1] ss:$4 sm:$0xff] %v337_v50  ;;  %v527_v29 = vsel %vm511_vm1, %v1042_v53, 0.0  ;;  %v361_v50 = vrot.slane %v279_v39, 6  ;;  %v362_v53 = vrot.slane %v280_v48, 2 }
  0x5a   : > { %430 = vst [vmem:[#allocation1 + $0x1] ss:$4 sm:$0xff] %v271_v49  ;;  %v528_v34 = vadd.f32 %v527_v29, %v526_v32 }
  0x5b   : > { %431 = vst [vmem:[#allocation1 + $0x2] ss:$4 sm:$0xff] %v338_v51 }
  0x5c   : > { %v1044_v57 = vld.sshfl [vmem:[#allocation1 + $0x20] sm:$0xff pattern:$0x73625140]  ;;  %432 = vst [vmem:[#allocation1 + $0x3] ss:$4 sm:$0xff] %v339_v54  ;;  %v281_v54 = vld [vmem:[%s1006_s27 + $0xa8] sm:$0xff] }
  0x5d   : > { %433 = vst [vmem:[#allocation1 + $0x20] ss:$4 sm:$0xff] %v272_v52  ;;  %v529_v37 = vsel %vm511_vm1, %v1044_v57, 0.0  ;;  %v365_v61 = vrot.slane %v281_v54, 4 }
  0x5e   : > { %434 = vst [vmem:[#allocation1 + $0x21] ss:$4 sm:$0xff] %v340_v55  ;;  %v530_v42 = vadd.f32 %v529_v37, %v528_v34 }
  0x5f   : > { %435 = vst [vmem:[#allocation1 + $0x22] ss:$4 sm:$0xff] %v341_v56  ;;  %v363_v56 = vrot.slane %v280_v48, 4 }
  0x60   : > { %436 = vst [vmem:[#allocation1 + $0x23] ss:$4 sm:$0xff] %v342_v58  ;;  %v364_v58 = vrot.slane %v281_v54, 2 }
  0x63   : > { %v437_v1 = vld.sshfl [vmem:[#allocation1] sm:$0xff pattern:$0x73625140] }
  0x64   : > { %439 = vst [vmem:[#allocation1] ss:$4 sm:$0xff] %v273_v59  ;;  %v531_v41 = vsel %vm511_vm1, %v437_v1, 0.0 }
  0x65   : > { %440 = vst [vmem:[#allocation1 + $0x1] ss:$4 sm:$0xff] %v343_v60  ;;  %v532_v45 = vadd.f32 %v531_v41, %v530_v42 }
  0x66   : > { %441 = vst [vmem:[#allocation1 + $0x2] ss:$4 sm:$0xff] %v344_v63 }
  0x67   : > { %v438_v8 = vld.sshfl [vmem:[#allocation1 + $0x20] sm:$0xff pattern:$0x73625140]  ;;  %442 = vst [vmem:[#allocation1 + $0x3] ss:$4 sm:$0xff] %v345_v2  ;;  %v366_v2 = vrot.slane %v281_v54, 6 }
  0x68   : > { %443 = vst [vmem:[#allocation1 + $0x20] ss:$4 sm:$0xff] %v274_v0  ;;  %v533_v46 = vsel %vm511_vm1, %v438_v8, 0.0  ;;  %v282_v0 = vld [vmem:[%s1006_s27 + $0xb0] sm:$0xff]  ;;  %v283_v8 = vld [vmem:[%s1006_s27 + $0xb8] sm:$0x3f] }
  0x69   : > { %444 = vst [vmem:[#allocation1 + $0x21] ss:$4 sm:$0xff] %v346_v5  ;;  %v534_v51 = vadd.f32 %v533_v46, %v532_v45  ;;  %v367_v4 = vrot.slane %v282_v0, 2  ;;  %v368_v7 = vrot.slane %v282_v0, 4  ;;  %v369_v9 = vrot.slane %v282_v0, 6 }
  0x6a   : > { %445 = vst [vmem:[#allocation1 + $0x22] ss:$4 sm:$0xff] %v347_v6  ;;  %v370_v12 = vrot.slane %v283_v8, 2 }
  0x6b   : > { %446 = vst [vmem:[#allocation1 + $0x23] ss:$4 sm:$0xff] %v275_v10 }
  0x6e   : > { %v447_v19 = vld.sshfl [vmem:[#allocation1] sm:$0xff pattern:$0x73625140] }
  0x6f   : > { %449 = vst [vmem:[#allocation1] ss:$4 sm:$0xff] %v348_v13  ;;  %v535_v49 = vsel %vm511_vm1, %v447_v19, 0.0  ;;  %v371_v13 = vrot.slane %v283_v8, 4 }
  0x70   : > { %450 = vst [vmem:[#allocation1 + $0x1] ss:$4 sm:$0xff] %v349_v14  ;;  %v536_v55 = vadd.f32 %v535_v49, %v534_v51 }
  0x71   : > { %451 = vst [vmem:[#allocation1 + $0x2] ss:$4 sm:$0xff] %v350_v17 }
  0x72   : > { %v448_v25 = vld.sshfl [vmem:[#allocation1 + $0x20] sm:$0xff pattern:$0x73625140]  ;;  %452 = vst [vmem:[#allocation1 + $0x3] ss:$4 sm:$0xff] %v276_v15 }
  0x73   : > { %453 = vst [vmem:[#allocation1 + $0x20] ss:$4 sm:$0xff] %v351_v20  ;;  %v537_v57 = vsel %vm511_vm1, %v448_v25, 0.0 }
  0x74   : > { %454 = vst [vmem:[#allocation1 + $0x21] ss:$4 sm:$0xff] %v352_v22  ;;  %v538_v62 = vadd.f32 %v537_v57, %v536_v55 }
  0x75   : > { %455 = vst [vmem:[#allocation1 + $0x22] ss:$4 sm:$0xff] %v353_v24 }
  0x76   : > { %456 = vst [vmem:[#allocation1 + $0x23] ss:$4 sm:$0xff] %v277_v27 }
  0x79   : > { %v457_v35 = vld.sshfl [vmem:[#allocation1] sm:$0xff pattern:$0x73625140] }
  0x7a   : > { %459 = vst [vmem:[#allocation1] ss:$4 sm:$0xff] %v354_v30  ;;  %v539_v59 = vsel %vm511_vm1, %v457_v35, 0.0 }
  0x7b   : > { %460 = vst [vmem:[#allocation1 + $0x1] ss:$4 sm:$0xff] %v355_v33  ;;  %v540_v63 = vadd.f32 %v539_v59, %v538_v62 }
  0x7c   : > { %461 = vst [vmem:[#allocation1 + $0x2] ss:$4 sm:$0xff] %v278_v31  ;;  %v259_v31 = vld [vmem:[#allocation2] sm:$0x1] }
  0x7d   : > { %v458_v43 = vld.sshfl [vmem:[#allocation1 + $0x20] sm:$0xff pattern:$0x73625140]  ;;  %462 = vst [vmem:[#allocation1 + $0x3] ss:$4 sm:$0xff] %v356_v36 }
  0x7e   : > { %463 = vst [vmem:[#allocation1 + $0x20] ss:$4 sm:$0xff] %v357_v38  ;;  %v541_v1 = vsel %vm511_vm1, %v458_v43, 0.0 }
  0x7f   : > { %464 = vst [vmem:[#allocation1 + $0x21] ss:$4 sm:$0xff] %v358_v40  ;;  %v542_v5 = vadd.f32 %v541_v1, %v540_v63 }
  0x80   : > { %465 = vst [vmem:[#allocation1 + $0x22] ss:$4 sm:$0xff] %v279_v39 }
  0x81   : > { %466 = vst [vmem:[#allocation1 + $0x23] ss:$4 sm:$0xff] %v359_v44 }
  0x84   : > { %v467_v52 = vld.sshfl [vmem:[#allocation1] sm:$0xff pattern:$0x73625140] }
  0x85   : > { %469 = vst [vmem:[#allocation1] ss:$4 sm:$0xff] %v360_v47  ;;  %v543_v3 = vsel %vm511_vm1, %v467_v52, 0.0 }
  0x86   : > { %470 = vst [vmem:[#allocation1 + $0x1] ss:$4 sm:$0xff] %v361_v50  ;;  %v544_v10 = vadd.f32 %v543_v3, %v542_v5 }
  0x87   : > { %471 = vst [vmem:[#allocation1 + $0x2] ss:$4 sm:$0xff] %v280_v48 }
  0x88   : > { %472 = vst [vmem:[#allocation1 + $0x3] ss:$4 sm:$0xff] %v362_v53  ;;  %v468_v60 = vld.sshfl [vmem:[#allocation1 + $0x20] sm:$0xff pattern:$0x73625140] }
  0x89   : > { %473 = vst [vmem:[#allocation1 + $0x20] ss:$4 sm:$0xff] %v363_v56  ;;  %v545_v11 = vsel %vm511_vm1, %v468_v60, 0.0 }
  0x8a   : > { %474 = vst [vmem:[#allocation1 + $0x21] ss:$4 sm:$0xff] %v281_v54  ;;  %v546_v16 = vadd.f32 %v545_v11, %v544_v10 }
  0x8b   : > { %475 = vst [vmem:[#allocation1 + $0x22] ss:$4 sm:$0xff] %v364_v58 }
  0x8c   : > { %476 = vst [vmem:[#allocation1 + $0x23] ss:$4 sm:$0xff] %v365_v61 }
  0x8f   : > { %v477_v6 = vld.sshfl [vmem:[#allocation1] sm:$0xff pattern:$0x73625140] }
  0x90   : > { %479 = vst [vmem:[#allocation1] ss:$4 sm:$0xff] %v366_v2  ;;  %v547_v15 = vsel %vm511_vm1, %v477_v6, 0.0 }
  0x91   : > { %480 = vst [vmem:[#allocation1 + $0x1] ss:$4 sm:$0xff] %v282_v0  ;;  %v548_v17 = vadd.f32 %v547_v15, %v546_v16 }
  0x92   : > { %481 = vst [vmem:[#allocation1 + $0x2] ss:$4 sm:$0xff] %v367_v4 }
  0x93   : > { %v478_v14 = vld.sshfl [vmem:[#allocation1 + $0x20] sm:$0xff pattern:$0x73625140]  ;;  %482 = vst [vmem:[#allocation1 + $0x3] ss:$4 sm:$0xff] %v368_v7 }
  0x94   : > { %483 = vst [vmem:[#allocation1 + $0x20] ss:$4 sm:$0xff] %v369_v9  ;;  %v549_v18 = vsel %vm511_vm1, %v478_v14, 0.0 }
  0x95   : > { %484 = vst [vmem:[#allocation1 + $0x21] ss:$4 sm:$0xff] %v283_v8  ;;  %v550_v20 = vadd.f32 %v549_v18, %v548_v17 }
  0x96   : > { %485 = vst [vmem:[#allocation1 + $0x22] ss:$4 sm:$0xff] %v370_v12 }
  0x97   : > { %486 = vst [vmem:[#allocation1 + $0x23] ss:$4 sm:$0xff] %v371_v13 }
  0x9a   : > { %v487_v19 = vld.sshfl [vmem:[#allocation1] sm:$0xff pattern:$0x73625140] }
  0x9b   : > { %v551_v21 = vsel %vm511_vm1, %v487_v19, 0.0 }
  0x9c   : > { %v552_v22 = vadd.f32 %v551_v21, %v550_v20 }
  0x9e   : > { %v488_v23 = vld.sshfl [vmem:[#allocation1 + $0x20] sm:$0xff pattern:$0x73625140] }
  0x9f   : > { %v553_v24 = vsel %vm511_vm1, %v488_v23, 0.0 }
  0xa0   : > { %v554_v25 = vadd.f32 %v553_v24, %v552_v22 }
  0xa2   : > { %v555_v26 = vrot.slane %v554_v25, 4 }
  0xa4   : > { %v556_v27 = vadd.f32 %v555_v26, %v554_v25 }
  0xa6   : > { %v557_v28 = vrot.slane %v556_v27, 2 }
  0xa8   : > { %v558_v29 = vadd.f32 %v557_v28, %v556_v27 }
  0xaa   : > { %v559_v30 = vrot.slane %v558_v29, 1 }
  0xac   : > { %v560_v32 = vadd.f32 %v559_v30, %v558_v29  ;;  %567 = sbr.rel (%p724_p1) target bundleno = 445 (0x1bd), region = 48 }
  0xae   : > { %v561_v33 = vadd.f32 %v560_v32, %v259_v31 }
  0xb0   : > { %563 = vst.msk [vmem:[#allocation2] sm:$0x1] %vm562_vm2, %v561_v33 }
  0xb1   : > { %v570_v34 = vld [vmem:[%s1159_s1] sm:$0xff]  ;;  %v600_v36 = vld [vmem:[%s1161_s3 + $0x18] sm:$0xff]  ;;  %v599_v38 = vld [vmem:[%s1161_s3 + $0x10] sm:$0xff]  ;;  %vm601_vm3 = vcmask 261120   ;;  %vm626_vm4 = vcmask 253952  }
  0xb2   : > { %590 = vmatpush.msra.mxu0 %v570_v34  ;;  %617 = vmatpush.msra.mxu1 %v600_v36  ;;  %v598_v39 = vld [vmem:[%s1161_s3 + $0x8] sm:$0xff]  ;;  %v597_v40 = vld [vmem:[%s1161_s3] sm:$0xff] }
  0xb3   : > { %v571_v41 = vld [vmem:[%s1160_s2] sm:$0x1] }
  0xb4   : > { %618 = vmatpush.msra.mxu1 %v599_v38  ;;  %v596_v45 = vld [vmem:[%s1162_s4] sm:$0x1] }
  0xb6   : > { %619 = vmatpush.msra.mxu1 %v598_v39 }
  0xb7   : > { %v568_v35 = vld [vmem:[#allocation2] sm:$0x1] }
  0xb8   : > { %v569_v37 = vmul.f32 0.00390625, %v568_v35  ;;  %620 = vmatpush.msra.mxu1 %v597_v40 }
  0xba   : > { %725 = vmatmul.msk.f32.vlgmr.msra.gmra.mxu0 %vm511_vm1, %v569_v37 }
 0x137   : > { %v592_v42 = vpop.f32.mrf.mxu0 }
 0x138   : > { %v593_v43 = vadd.f32 %v592_v42, %v571_v41 }
 0x13a   : > { %v595_v44 = vmax.f32 %v593_v43, 0.0 }
 0x13c   : > { %726 = vmatmul.msk.f32.vlgmr.msra.gmra.mxu1 %vm601_vm3, %v595_v44 }
 0x1b9   : > { %v622_v46 = vpop.f32.mrf.mxu1 }
 0x1ba   : > { %v625_v47 = vadd.f32 %v622_v46, %v596_v45 }
 0x1bc   : > { %627 = vst.msk [vmem:[%s1010_s7] sm:$0x1] %vm626_vm4, %v625_v47 }
 0x1bd PF: > { %s637_s15 = scalar_lea.hbm %s1163_s5, %s885_s22  ;;  %s639_s21 = sshll.u32 %s1010_s7, 4  ;;  %s640_s21 = int_to_ptr.vmem [resolvable:$true] %s639_s21 }
 0x1be   : > { %s641_s16 = sshll.u32 %s637_s15, 4  ;;  %s629_s17 = scalar_lea.sflag [#allocation4], %s240_s10  ;;  %s642_s16 = int_to_ptr.hbm [resolvable:$true] %s641_s16 }
 0x1bf   : > { %s817_s26 = sshra.s32 %s642_s16, 4  ;;  %s823_s12 = scalar_lea.hbm %s1163_s5, 2  ;;  %s818_s26 = int_to_ptr.hbm [resolvable:$true] %s817_s26 }
 0x1c0   : > { %s819_s27 = scalar_lea.hbm %s818_s26, 1  ;;  %p824_p6 = scmp.lt.s32.totalorder %s818_s26, %s1163_s5 }
 0x1c1   : > { %p820_p2 = scmp.ne.s32.totalorder %s818_s26, %s819_s27  ;;  %p825_p7 = scmp.lt.s32.totalorder %s823_s12, %s819_s27 }
 0x1c3   : > { %p821_p4 = pnand %p820_p2, %p979_p3  ;;  %p826_p8 = por %p825_p7, %p824_p6 }
 0x1c5   : > { %p822_p5 = pneg %p821_p4 }
 0x1c7   : > { %p827_p10 = pnand %p826_p8, %p822_p5 }
 0x1c9   : > { %830 = shalt.err (!%p827_p10)
}
 0x1ca   : > { %731 = dma.vmem_to_hbm [thread:$0]  (%p979_p3), %s640_s21, 16, %s642_s16, %s629_s17  }
 0x1cb PF: > { %p737_p11 = scmp.ge.s32.totalorder %s897_s25, 2  ;;  %s653_s22 = sand.u32 1, %s869_s18  }
 0x1cc   : > { %s654_s10 = scalar_lea.sflag [#allocation4], %s653_s22 }
 0x1cd   : > { %p734_p12 = pnand %p737_p11, %p989_p9 }
 0x1cf   : > { %p735_p13 = pneg %p734_p12 }
 0x1d1   : > { %864 = dma.done.wait (%p735_p13), %s654_s10, 16  }
 0x1d2   : > { %866 = vsyncadd (%p735_p13), %s654_s10, 4294967280  ;;  %s18_s25 = sadd.s32 1, %s897_s25   ;;  %s1166_s18 = smov %s873_s19 }
 0x1d3   : > { %p15_p0 = scmp.ge.s32.totalorder %s18_s25, 8   ;;  %s1167_s19 = smov %s877_s20 }
 0x1d4   : > { %s1168_s20 = smov %s997_s9  ;;  %s1169_s21 = smov %s889_s23 }
 0x1d5   : > { %s1170_s22 = smov %s893_s24  ;;  %s1171_s23 = smov %s1174_s28 }
 0x1d6   : > { %s1172_s24 = smov %s1178_s29  ;;  %17 = sbr.rel (!%p15_p0) target bundleno = 5 (0x5), region = 90 }
 0x1db   :  { %659 = vsyncpa [#allocation4], 1 }
 0x1dc   :  { %661 = vsyncpa [#allocation4 + $0x1], 1 }

</bundles_post_ra>
